<compile_context>
chip_gen: v5e
topology: v5e:2x2
jax: 0.10.0
libtpu: 0.0.40
codegen_flags: <defaults>
</compile_context>

<pallas_src>
import math

import jax
import jax.numpy as jnp
from jax import lax
from jax.experimental import pallas as pl
from jax.experimental.pallas import tpu as pltpu


def _attention_body(x_ref, w_ref, o_ref, a_ref):
    Bb, T, H = x_ref.shape
    three_d = w_ref.shape[1]
    D = three_d // 3

    # Fused QKV projection on the MXU: (Bb*T, H) @ (H, 3D), bf16 in / f32 acc.
    x2 = x_ref[...].reshape(Bb * T, H)                       # bf16 (cast in wrapper)
    qkv = jnp.dot(x2, w_ref[...], preferred_element_type=jnp.float32)
    qkv = qkv.reshape(Bb, T, three_d)
    q = qkv[:, :, :D].astype(jnp.bfloat16)                   # 1/scale folded into W_q
    k = qkv[:, :, D:2 * D].astype(jnp.bfloat16)
    v = qkv[:, :, 2 * D:].astype(jnp.bfloat16)

    # Scores: batched contraction over D (no explicit transpose of k).
    s = jnp.einsum("bqd,bkd->bqk", q, k,
                   preferred_element_type=jnp.float32)       # (Bb, T, T) f32

    # Causal mask + numerically stable softmax.  Only one mask application is
    # needed: exp(-inf - m) is already exactly 0 for masked entries.
    row = lax.broadcasted_iota(jnp.int32, (Bb, T, T), 1)
    col = lax.broadcasted_iota(jnp.int32, (Bb, T, T), 2)
    s = jnp.where(col <= row, s, -jnp.inf)
    m = jnp.max(s, axis=-1, keepdims=True)
    p = jnp.exp(s - m)
    denom = jnp.sum(p, axis=-1, keepdims=True)
    attn = p * pl.reciprocal(denom, approx=True)             # EUP slot, ~free

    out = jnp.einsum("bqk,bkd->bqd", attn.astype(jnp.bfloat16), v,
                     preferred_element_type=jnp.float32)     # (Bb, T, D)

    # NOTE: last dim D may be < 128 (lane-sparse store); acceptable at these
    # shapes — for large D (>=128) the store is lane-dense automatically.
    o_ref[...] = out.astype(o_ref.dtype)
    if a_ref is not None:
        a_ref[...] = attn.astype(a_ref.dtype)


def _make_kernel(emit_attn: bool):
    if emit_attn:
        def kernel(x_ref, w_ref, o_ref, a_ref):
            _attention_body(x_ref, w_ref, o_ref, a_ref)
    else:
        def kernel(x_ref, w_ref, o_ref):
            _attention_body(x_ref, w_ref, o_ref, None)
    return kernel


def scaled_dot_product_attention_layer(inputs, w_q, w_k, w_v, *,
                                        return_attention=True,
                                        batch_block_rows=256):
    """JAX/Pallas equivalent of ScaledDotProductAttentionLayer.forward.

    inputs: (T, B, nhid) float32
    w_q, w_k, w_v: (nhid, query_dim) float32
    Returns (results, attention_thru_time):
      results: (T, B, query_dim)
      attention_thru_time: list; element 0 is ones(1); element i>=1 is the
                           (B, i+1) softmax weights for step i.
                           (None if return_attention=False.)
    """
    T, B, H = inputs.shape
    D = w_q.shape[1]
    scale = float(int(math.sqrt(D)))  # matches int(math.sqrt(query_dim))

    # Fused, pre-scaled (W_q / scale), bf16 QKV weight: (H, 3D).
    w_qkv = jnp.concatenate([w_q / scale, w_k, w_v], axis=1).astype(jnp.bfloat16)

    # Batch-major, bf16 activations for the MXU.
    x_btd = jnp.transpose(inputs, (1, 0, 2)).astype(jnp.bfloat16)   # (B, T, H)

    # Batch elements per grid block: fill the MXU M dimension (~256 rows).
    Bb = max(1, min(B, pl.cdiv(batch_block_rows, T)))
    B_pad = pl.cdiv(B, Bb) * Bb
    if B_pad != B:
        x_btd = jnp.pad(x_btd, ((0, B_pad - B), (0, 0), (0, 0)))

    kernel = _make_kernel(return_attention)

    if return_attention:
        out_shape = (jax.ShapeDtypeStruct((B_pad, T, D), inputs.dtype),
                     jax.ShapeDtypeStruct((B_pad, T, T), jnp.float32))
        out_specs = [pl.BlockSpec((Bb, T, D), lambda b: (b, 0, 0)),
                     pl.BlockSpec((Bb, T, T), lambda b: (b, 0, 0))]
    else:
        out_shape = jax.ShapeDtypeStruct((B_pad, T, D), inputs.dtype)
        out_specs = pl.BlockSpec((Bb, T, D), lambda b: (b, 0, 0))

    result = pl.pallas_call(
        kernel,
        out_shape=out_shape,
        grid_spec=pltpu.PrefetchScalarGridSpec(
            num_scalar_prefetch=0,
            grid=(B_pad // Bb,),
            in_specs=[
                pl.BlockSpec((Bb, T, H), lambda b: (b, 0, 0)),
                pl.BlockSpec((H, 3 * D), lambda b: (0, 0)),
            ],
            out_specs=out_specs,
        ),
        compiler_params=pltpu.CompilerParams(
            dimension_semantics=("parallel",),
            vmem_limit_bytes=64 * 1024 * 1024,
        ),
    )(x_btd, w_qkv)

    if return_attention:
        out_btd, attn_btt = result
    else:
        out_btd, attn_btt = result, None

    results = jnp.transpose(out_btd[:B], (1, 0, 2))  # (T, B, D)

    if not return_attention:
        return results, None

    # Rebuild the ragged attention list with the PyTorch shapes:
    # step 0 is ones(1); step i>=1 is (B, i+1) (after .squeeze(), B>1 case).
    attn_btt = attn_btt[:B]
    attention_thru_time = [jnp.ones((1,), dtype=jnp.float32)]
    for i in range(1, T):
        attention_thru_time.append(attn_btt[:, i, : i + 1])

    return results, attention_thru_time


def _xavier_uniform(key, shape, gain):
    # nn.init.xavier_uniform_ on a (nhid, query_dim) tensor.
    fan_out, fan_in = shape
    bound = gain * math.sqrt(6.0 / (fan_in + fan_out))
    return jax.random.uniform(key, shape, jnp.float32, -bound, bound)


def _reference_forward(inputs, w_q, w_k, w_v):
    """Pure-JAX f32 transliteration of the PyTorch loop (for verification)."""
    T, B, H = inputs.shape
    D = w_q.shape[1]
    scale = float(int(math.sqrt(D)))
    outs = []
    for i in range(T):
        if i < 1:
            outs.append(inputs[0] @ w_v)                         # (B, D)
        else:
            vec = jnp.transpose(inputs[: i + 1], (1, 0, 2))      # (B, i+1, H)
            q = vec[:, -1:, :] @ w_q                             # (B, 1, D)
            k = vec @ w_k                                        # (B, i+1, D)
            v = vec @ w_v                                        # (B, i+1, D)
            aw = jnp.einsum("bqd,bkd->bqk", q, k) / scale        # (B, 1, i+1)
            aw = jax.nn.softmax(aw, axis=-1)[:, 0, :]            # (B, i+1)
            outs.append(jnp.sum(v * aw[..., None], axis=1))      # (B, D)
    return jnp.stack(outs, axis=0)                               # (T, B, D)


if __name__ == "__main__":
    # Module hyperparameters (small, consistent with the forward pass).
    T, B, nhid = 8, 2, 32
    query_dim = nhid

    key = jax.random.PRNGKey(0)
    k_x, k_q, k_k, k_v = jax.random.split(key, 4)

    gain = math.sqrt(2.0)  # nn.init.calculate_gain('relu')
    W_q = _xavier_uniform(k_q, (nhid, query_dim), gain)
    W_k = _xavier_uniform(k_k, (nhid, query_dim), gain)
    W_v = _xavier_uniform(k_v, (nhid, query_dim), gain)

    inputs = jax.random.normal(k_x, (T, B, nhid), dtype=jnp.float32)

    # Full path (with attention-weights output, matching the PyTorch return).
    results, attention_thru_time = scaled_dot_product_attention_layer(
        inputs, W_q, W_k, W_v, return_attention=True
    )
    results = jax.block_until_ready(results)

    # Fast path (skips the O(T^2) attention writeback).
    results_fast, _ = scaled_dot_product_attention_layer(
        inputs, W_q, W_k, W_v, return_attention=False
    )
    results_fast = jax.block_until_ready(results_fast)

    # Verify against the f32 transliteration of the torch loop.  The kernel
    # runs its matmuls in bf16 (f32 accumulation), so use a loose relative
    # tolerance per the review's guidance.
    ref = _reference_forward(inputs, W_q, W_k, W_v)
    assert results.shape == (T, B, query_dim)
    assert len(attention_thru_time) == T
    assert attention_thru_time[1].shape == (B, 2)
    ref_scale = max(1.0, float(jnp.max(jnp.abs(ref))))
    err = float(jnp.max(jnp.abs(results - ref)))
    assert err <= 5e-2 * ref_scale, f"max abs err {err} vs ref scale {ref_scale}"
    err_fast = float(jnp.max(jnp.abs(results_fast - results)))
    assert err_fast <= 1e-3, f"fast-path mismatch {err_fast}"
    # Attention rows should (approximately) sum to 1.
    row_sums = jnp.sum(attention_thru_time[-1], axis=-1)
    assert bool(jnp.all(jnp.abs(row_sums - 1.0) < 1e-2))

    print("KERNEL_OK")
</pallas_src>

<mosaic_0001>
module attributes {stable_mosaic.version = 11 : i64} {
  func.func @kernel(%arg0: i32, %arg1: memref<2x8x32xbf16, #tpu.memory_space<vmem>>, %arg2: memref<32x96xbf16, #tpu.memory_space<vmem>>, %arg3: memref<2x8x32xf32, #tpu.memory_space<vmem>>, %arg4: memref<2x8x8xf32, #tpu.memory_space<vmem>>) attributes {dimension_semantics = [#tpu.dimension_semantics<parallel>], iteration_bounds = array<i64: 1>, scalar_prefetch = 0 : i64, scratch_operands = 0 : i64, tpu.core_type = #tpu.core_type<tc>, window_params = [{transform_indices = @transform_0, window_bounds = array<i64: 2, 8, 32>}, {pipeline_mode = #tpu.pipeline_mode<synchronous>, transform_indices = @transform_1, window_bounds = array<i64: 32, 96>}, {transform_indices = @transform_2, window_bounds = array<i64: 2, 8, 32>}, {transform_indices = @transform_3, window_bounds = array<i64: 2, 8, 8>}]} {
    %c0 = arith.constant 0 : index
    %c0_0 = arith.constant 0 : index
    %c0_1 = arith.constant 0 : index
    %0 = vector.load %arg1[%c0, %c0_0, %c0_1] : memref<2x8x32xbf16, #tpu.memory_space<vmem>>, vector<2x8x32xbf16>
    %1 = vector.shape_cast %0 : vector<2x8x32xbf16> to vector<16x32xbf16>
    %c0_2 = arith.constant 0 : index
    %c0_3 = arith.constant 0 : index
    %2 = vector.load %arg2[%c0_2, %c0_3] : memref<32x96xbf16, #tpu.memory_space<vmem>>, vector<32x96xbf16>
    %cst = arith.constant dense<0.000000e+00> : vector<16x96xf32>
    %3 = tpu.matmul %1, %2, %cst {dimension_numbers = #tpu.dot_dimension_numbers<[1], [0], [0], [1], [0, 0, 1, 1], [], []>} : vector<16x32xbf16>, vector<32x96xbf16>, vector<16x96xf32> -> vector<16x96xf32>
    %4 = vector.shape_cast %3 : vector<16x96xf32> to vector<2x8x96xf32>
    %5 = vector.extract_strided_slice %4 {offsets = [0, 0, 0], sizes = [2, 8, 32], strides = [1, 1, 1]} : vector<2x8x96xf32> to vector<2x8x32xf32>
    %6 = arith.truncf %5 : vector<2x8x32xf32> to vector<2x8x32xbf16>
    %7 = vector.extract_strided_slice %4 {offsets = [0, 0, 32], sizes = [2, 8, 32], strides = [1, 1, 1]} : vector<2x8x96xf32> to vector<2x8x32xf32>
    %8 = arith.truncf %7 : vector<2x8x32xf32> to vector<2x8x32xbf16>
    %9 = vector.extract_strided_slice %4 {offsets = [0, 0, 64], sizes = [2, 8, 32], strides = [1, 1, 1]} : vector<2x8x96xf32> to vector<2x8x32xf32>
    %10 = arith.truncf %9 : vector<2x8x32xf32> to vector<2x8x32xbf16>
    "tpu.trace_start"() <{level = 10 : i32, message = "bqd,bkd->bqk"}> : () -> ()
    %cst_4 = arith.constant dense<0.000000e+00> : vector<2x8x8xf32>
    %11 = tpu.matmul %6, %8, %cst_4 {dimension_numbers = #tpu.dot_dimension_numbers<[2], [2], [1], [1], [0, 0, 0, 1, 1, 1], [0], [0]>} : vector<2x8x32xbf16>, vector<2x8x32xbf16>, vector<2x8x8xf32> -> vector<2x8x8xf32>
    "tpu.trace_stop"() : () -> ()
    %12 = tpu.iota {dimensions = array<i32: 1>} : vector<2x8x8xi32>
    %13 = tpu.iota {dimensions = array<i32: 2>} : vector<2x8x8xi32>
    %14 = arith.cmpi sle, %13, %12 : vector<2x8x8xi32>
    %cst_5 = arith.constant 0xFF800000 : f32
    %15 = vector.broadcast %cst_5 : f32 to vector<2x8x8xf32>
    %16 = arith.select %14, %11, %15 : vector<2x8x8xi1>, vector<2x8x8xf32>
    %cst_6 = arith.constant dense<0xFF800000> : vector<2x8xf32>
    %17 = vector.multi_reduction <maximumf>, %16, %cst_6 [2] : vector<2x8x8xf32> to vector<2x8xf32>
    %18 = vector.shape_cast %17 : vector<2x8xf32> to vector<2x8x1xf32>
    %19 = vector.broadcast %18 : vector<2x8x1xf32> to vector<2x8x8xf32>
    %20 = arith.subf %16, %19 : vector<2x8x8xf32>
    %21 = math.exp %20 : vector<2x8x8xf32>
    %cst_7 = arith.constant dense<0.000000e+00> : vector<2x8xf32>
    %22 = vector.multi_reduction <add>, %21, %cst_7 [2] : vector<2x8x8xf32> to vector<2x8xf32>
    %23 = vector.shape_cast %22 : vector<2x8xf32> to vector<2x8x1xf32>
    %24 = tpu.reciprocal %23 {approx = true} : vector<2x8x1xf32> -> vector<2x8x1xf32>
    %25 = vector.broadcast %24 : vector<2x8x1xf32> to vector<2x8x8xf32>
    %26 = arith.mulf %21, %25 : vector<2x8x8xf32>
    %27 = arith.truncf %26 : vector<2x8x8xf32> to vector<2x8x8xbf16>
    "tpu.trace_start"() <{level = 10 : i32, message = "bqk,bkd->bqd"}> : () -> ()
    %cst_8 = arith.constant dense<0.000000e+00> : vector<2x8x32xf32>
    %28 = tpu.matmul %27, %10, %cst_8 {dimension_numbers = #tpu.dot_dimension_numbers<[2], [1], [1], [2], [0, 0, 0, 1, 1, 2], [0], [0]>} : vector<2x8x8xbf16>, vector<2x8x32xbf16>, vector<2x8x32xf32> -> vector<2x8x32xf32>
    "tpu.trace_stop"() : () -> ()
    %c0_9 = arith.constant 0 : index
    %c0_10 = arith.constant 0 : index
    %c0_11 = arith.constant 0 : index
    %29 = vector.load %arg3[%c0_9, %c0_10, %c0_11] : memref<2x8x32xf32, #tpu.memory_space<vmem>>, vector<2x8x32xf32>
    tpu.vector_store %arg3[%c0_9, %c0_10, %c0_11], %28 {strides = array<i32>} : memref<2x8x32xf32, #tpu.memory_space<vmem>>, vector<2x8x32xf32>,
    %c0_12 = arith.constant 0 : index
    %c0_13 = arith.constant 0 : index
    %c0_14 = arith.constant 0 : index
    %30 = vector.load %arg4[%c0_12, %c0_13, %c0_14] : memref<2x8x8xf32, #tpu.memory_space<vmem>>, vector<2x8x8xf32>
    tpu.vector_store %arg4[%c0_12, %c0_13, %c0_14], %26 {strides = array<i32>} : memref<2x8x8xf32, #tpu.memory_space<vmem>>, vector<2x8x8xf32>,
    return
  }
  func.func @transform_0(%arg0: i32) -> (i32, i32, i32) {
    %c0_i32 = arith.constant 0 : i32
    %c0_i32_0 = arith.constant 0 : i32
    %c0_i32_1 = arith.constant 0 : i32
    return %arg0, %c0_i32, %c0_i32_0 : i32, i32, i32
  }
  func.func @transform_1(%arg0: i32) -> (i32, i32) {
    %c0_i32 = arith.constant 0 : i32
    %c0_i32_0 = arith.constant 0 : i32
    %c0_i32_1 = arith.constant 0 : i32
    return %c0_i32, %c0_i32_0 : i32, i32
  }
  func.func @transform_2(%arg0: i32) -> (i32, i32, i32) {
    %c0_i32 = arith.constant 0 : i32
    %c0_i32_0 = arith.constant 0 : i32
    %c0_i32_1 = arith.constant 0 : i32
    return %arg0, %c0_i32, %c0_i32_0 : i32, i32, i32
  }
  func.func @transform_3(%arg0: i32) -> (i32, i32, i32) {
    %c0_i32 = arith.constant 0 : i32
    %c0_i32_0 = arith.constant 0 : i32
    %c0_i32_1 = arith.constant 0 : i32
    return %arg0, %c0_i32, %c0_i32_0 : i32, i32, i32
  }
}

</mosaic_0001>

<bundles_post_ra>
// kernel: tpu_custom_call.1
= control target key start
LH: loop header
LB: loop body
LE: loop exit
PB: predicated region body
PF: predicated region fallthrough
CT: control target
= control target key end

     0   :  { %9 = vsyncpa [#allocation3], 0  ;;  %s459_s0 = inlined_call_operand.hbm [shape: bf16[2,8,32], index: 0, kind: input, shape index: {}]   ;;  %s460_s1 = inlined_call_operand.hbm [shape: bf16[32,96], index: 1, kind: input, shape index: {}]   ;;  %s461_s2 = inlined_call_operand.hbm [shape: f32[2,8,32], index: 2, kind: output, shape index: {0}]   ;;  %s462_s3 = inlined_call_operand.hbm [shape: f32[2,8,8], index: 3, kind: output, shape index: {1}]  }
   0x1   :  { %10 = vsyncpa [#allocation6], 0 }
   0x2   :  { %11 = vsyncpa [#allocation4], 0 }
   0x3   :  { %12 = vsyncpa [#allocation9], 0  ;;  %s17_s14 = sshll.u32 %s459_s0, 4  ;;  %s397_s15 = smov [#allocation2]   ;;  %s18_s14 = int_to_ptr.hbm [resolvable:$true] %s17_s14 }
   0x4   :  { %s19_s16 = sshll.u32 %s397_s15, 4  ;;  %s30_s19 = sshll.u32 %s460_s1, 4  ;;  %s20_s16 = int_to_ptr.vmem [resolvable:$true] %s19_s16  ;;  %s31_s19 = int_to_ptr.hbm [resolvable:$true] %s30_s19 }
   0x5   :  { %s398_s20 = smov 64   ;;  %s399_s21 = smov 4  }
   0x6   :  { %25 = dma.hbm_to_vmem [thread:$0]  %s18_s14, 128, %s20_s16, [#allocation3], %s398_s20, %s398_s20, %s399_s21  }
   0x7   :  { %s400_s22 = smov [#allocation5]  }
   0x8   :  { %s32_s23 = sshll.u32 %s400_s22, 4  ;;  %s33_s23 = int_to_ptr.vmem [resolvable:$true] %s32_s23 }
   0x9   :  { %38 = dma.hbm_to_vmem [thread:$0]  %s31_s19, 256, %s33_s23, [#allocation6], %s398_s20, %s398_s20, %s399_s21  }
   0xa   :  { %389 = dma.done.wait [#allocation3], 128  }
   0xb   :  { %390 = vsyncadd [#allocation3], 4294967168 }
   0xc   :  { %391 = dma.done.wait [#allocation6], 256  }
   0xd   :  { %392 = vsyncadd [#allocation6], 4294967040  ;;  %v275_v0 = vld [vmem:[#allocation5 + $0x8] sm:$0xff]  ;;  %v274_v1 = vld [vmem:[#allocation5] sm:$0xff]  ;;  %vm71_vm0 = vcmask 261120   ;;  %s401_s0 = smov 96   ;;  %v139_v15 = vlaneseq }
   0xe   :  { %81 = vmatpush.bf16.msra.mxu0 %v275_v0  ;;  %v273_v2 = vld [vmem:[#allocation2] sm:$0xff]  ;;  %vm146_vm2 = vcmask 64512   ;;  %vm176_vm3 = vcmask 1043456   ;;  %s402_s1 = smov [#allocation8]   ;;  %s237_s27 = sshll.u32 %s462_s3, 4  ;;  %s238_s27 = int_to_ptr.hbm [resolvable:$true] %s237_s27 }
   0xf   :  { %v140_v16 = vshrl.u32 %v139_v15, 7  ;;  %v142_v17 = vand.u32 127, %v139_v15  ;;  %s235_s24 = sshll.u32 %s402_s1, 4  ;;  %s403_s28 = smov 128   ;;  %s236_s24 = int_to_ptr.vmem [resolvable:$true] %s235_s24 }
  0x10   :  { %s404_s29 = smov 8   ;;  %s405_s30 = smov [#allocation7]  }
  0x11   :  { %vm143_vm1 = vcmp.le.s32.totalorder %v142_v17, %v140_v16  ;;  %s222_s4 = sshll.u32 %s405_s30, 4  ;;  %s224_s7 = sshll.u32 %s461_s2, 4  ;;  %s223_s4 = int_to_ptr.vmem [resolvable:$true] %s222_s4  ;;  %s225_s7 = int_to_ptr.hbm [resolvable:$true] %s224_s7 }
  0x12   :  { %82 = vmatpush.bf16.msra.mxu0 %v274_v1 }
  0x15   :  { %268 = vmatmul.msk.bf16.vlgmr.msra.gmra.mxu0 %vm71_vm0, %v273_v2 }
  0x92   :  { %v84_v3 = vpop.f32.mrf.mxu0 }
  0x93   :  { %v89_v4 = vpack.c.bf16 %v84_v3, %v84_v3 }
  0x95   :  { %v92_v5 = vunpack.c.l.b16 %v89_v4 }
  0x97   :  { %v93_v6 = vpack.c.b16 %v92_v5, %v92_v5 }
  0x99   :  { %94 = vrot.lane.b32.xlu0 %v93_v6, %s401_s0 }
  0x9a   :  { %v86_v7 = vpop.f32.mrf.mxu0 }
  0x9b   :  { %v90_v8 = vpack.c.bf16 %v86_v7, %v86_v7 }
  0x9d   :  { %v116_v9 = vunpack.c.l.b16 %v90_v8 }
  0x9f   :  { %v117_v10 = vpack.c.b16 %v116_v9, %v116_v9 }
  0xa1   :  { %118 = vrot.lane.b32.xlu0 %v117_v10, %s401_s0 }
 0x10b   :  { %v95_v11 = vpop.permute.xlu0 %94 }
 0x10c   :  { %v100_v12 = vsel %vm71_vm0, %v95_v11, 0 }
 0x10d   :  { %109 = vmatpush.bf16.xpose.msra.mxu1 %v100_v12 }
 0x113   :  { %v119_v13 = vpop.permute.xlu0 %118 }
 0x114   :  { %269 = vmatmul.msk.bf16.vlgmr.msra.gmra.mxu1 %vm71_vm0, %v89_v4  ;;  %v124_v14 = vsel %vm71_vm0, %v119_v13, 0 }
 0x115   :  { %133 = vmatpush.bf16.xpose.msra.mxu2 %v124_v14 }
 0x11c   :  { %270 = vmatmul.msk.bf16.vlgmr.msra.gmra.mxu2 %vm71_vm0, %v90_v8 }
 0x191   :  { %v111_v18 = vpop.f32.mrf.mxu1 }
 0x192   :  { %v144_v19 = vsel %vm143_vm1, %v111_v18, -inf }
 0x193   :  { %v147_v20 = vsel %vm146_vm2, %v144_v19, -inf }
 0x194   :  { %148 = vmax.xlane.f32.xlu1 %v147_v20 }
 0x199   :  { %v113_v21 = vpop.f32.mrf.mxu1 }
 0x19f   :  { %v135_v22 = vpop.f32.mrf.mxu2 }
 0x1a0   :  { %v145_v23 = vsel %vm143_vm1, %v135_v22, -inf }
 0x1a1   :  { %v150_v24 = vsel %vm146_vm2, %v145_v23, -inf }
 0x1a2   :  { %151 = vmax.xlane.f32.xlu1 %v150_v24 }
 0x1a7   :  { %v137_v25 = vpop.f32.mrf.mxu2 }
 0x1bb   :  { %193 = vrot.lane.b32.xlu1 %v117_v10, %s398_s20 }
 0x207   :  { %v149_v26 = vpop.xlane.xlu1 %148 }
 0x208   :  { %v153_v27 = vsub.f32 %v144_v19, %v149_v26 }
 0x20a   :  { %v155_v28 = vmul.f32 1.442695, %v153_v27 }
 0x20c   :  { %285 = vpow2.f32 %v155_v28 }
 0x212   :  { %v286_v29 = vpop.eup %285 }
 0x213   :  { %v159_v30 = vsel %vm146_vm2, %v286_v29, 0.0 }
 0x214   :  { %160 = vadd.xlane.f32.xlu2 %v159_v30 }
 0x215   :  { %v152_v31 = vpop.xlane.xlu1 %151 }
 0x216   :  { %v154_v32 = vsub.f32 %v145_v23, %v152_v31 }
 0x218   :  { %v157_v33 = vmul.f32 1.442695, %v154_v32 }
 0x21a   :  { %287 = vpow2.f32 %v157_v33 }
 0x220   :  { %v288_v34 = vpop.eup %287 }
 0x221   :  { %v162_v35 = vsel %vm146_vm2, %v288_v34, 0.0 }
 0x222   :  { %163 = vadd.xlane.f32.xlu0 %v162_v35 }
 0x22c   :  { %171 = vrot.lane.b32.xlu2 %v93_v6, %s398_s20 }
 0x22d   :  { %v194_v38 = vpop.permute.xlu1 %193 }
 0x22e   :  { %v199_v42 = vsel %vm176_vm3, %v194_v38, 0 }
 0x287   :  { %v161_v36 = vpop.xlane.xlu2 %160 }
 0x288   :  { %289 = vrcp.f32 %v161_v36 }
 0x28e   :  { %v290_v37 = vpop.eup %289 }
 0x28f   :  { %v172_v39 = vpop.permute.xlu2 %171  ;;  %v167_v40 = vmul.f32 %v290_v37, %v286_v29 }
 0x290   :  { %v178_v41 = vsel %vm176_vm3, %v172_v39, 0 }
 0x291   :  { %187 = vmatpush.bf16.msra.mxu3 %v178_v41  ;;  %v169_v43 = vpack.c.bf16 %v167_v40, %v167_v40  ;;  %216 = vst.msk [vmem:[#allocation8] sm:$0xff] %vm146_vm2, %v167_v40 }
 0x294   :  { %271 = vmatmul.msk.bf16.vlgmr.msra.gmra.mxu3 %vm146_vm2, %v169_v43 }
 0x295   :  { %208 = vmatpush.bf16.msrb.mxu3 %v199_v42  ;;  %v164_v44 = vpop.xlane.xlu0 %163 }
 0x296   :  { %291 = vrcp.f32 %v164_v44 }
 0x29c   :  { %v292_v45 = vpop.eup %291 }
 0x29d   :  { %v168_v46 = vmul.f32 %v292_v45, %v288_v34 }
 0x29f   :  { %217 = vst.msk [vmem:[#allocation8 + $0x8] sm:$0xff] %vm146_vm2, %v168_v46  ;;  %v170_v47 = vpack.c.bf16 %v168_v46, %v168_v46 }
 0x2a0   :  { %243 = dma.vmem_to_hbm [thread:$0]  %s236_s24, 256, %s238_s27, [#allocation9], %s403_s28, %s403_s28, %s404_s29  }
 0x2a4   :  { %272 = vmatmul.msk.bf16.vlgmr.msrb.gmra.mxu3 %vm146_vm2, %v170_v47 }
 0x317   :  { %v189_v48 = vpop.f32.mrf.mxu3 }
 0x318   :  { %214 = vst.msk [vmem:[#allocation7] sm:$0xff] %vm71_vm0, %v189_v48 }
 0x31f   :  { %v191_v49 = vpop.f32.mrf.mxu3 }
 0x327   :  { %v210_v50 = vpop.f32.mrf.mxu3 }
 0x328   :  { %215 = vst.msk [vmem:[#allocation7 + $0x8] sm:$0xff] %vm71_vm0, %v210_v50 }
 0x329   :  { %230 = dma.vmem_to_hbm [thread:$0]  %s223_s4, 256, %s225_s7, [#allocation4], %s403_s28, %s403_s28, %s404_s29  }
 0x32f   :  { %v212_v51 = vpop.f32.mrf.mxu3 }
 0x330   :  { %393 = dma.done.wait [#allocation4], 256  }
 0x331   :  { %394 = vsyncadd [#allocation4], 4294967040 }
 0x332   :  { %395 = dma.done.wait [#allocation9], 256  }
 0x333   :  { %396 = vsyncadd [#allocation9], 4294967040 }
 0x334   :  { %252 = vsyncpa [#allocation3], 1 }
 0x335   :  { %253 = vsyncpa [#allocation6], 1 }
 0x336   :  { %254 = vsyncpa [#allocation4], 1 }
 0x337   :  { %255 = vsyncpa [#allocation9], 1 }

</bundles_post_ra>
